<compile_context>
chip_gen: v5e
topology: v5e:2x2
jax: 0.10.0
libtpu: 0.0.40
codegen_flags: <defaults>
</compile_context>

<pallas_src>
import functools

import jax
import jax.numpy as jnp
from jax import lax
from jax.experimental import pallas as pl
from jax.experimental.pallas import tpu as pltpu

HIDDEN = 200          # logical hidden width (matches the PyTorch module)
HIDDEN_PAD = 256      # lane-exact padded hidden width
LANE = 128
SUBLANE = 8
EPS = 1e-5
NEG_SLOPE = 0.01


def _mlp_kernel(n_ref,
                x_ref,
                w1_ref, g1_ref, be1_ref,
                w2_ref, g2_ref, be2_ref,
                w3_ref, b3_ref,
                o_ref):
    """Fused fc1 -> bn1 -> lrelu -> fc2 -> bn2 -> lrelu -> head.

    n_ref: SMEM scalar with the *real* batch size (padded rows beyond it are
    zero on entry).  x / w* are bf16 (MXU inputs); BN stats, affine, head bias
    and the output are f32.  fc1/fc2 biases are omitted (cancelled by
    batch-statistic BatchNorm).
    """
    n = n_ref[0]
    inv_n = 1.0 / n.astype(jnp.float32)

    def bn_lrelu(h, g, be):
        # One-pass batch statistics (biased variance), folded affine.
        # Padded rows are zero on entry to each BN, so s1/s2 divided by the
        # real n are exact.
        s1 = jnp.sum(h, axis=0, keepdims=True)
        s2 = jnp.sum(h * h, axis=0, keepdims=True)
        mu = s1 * inv_n
        var = s2 * inv_n - mu * mu
        scale = g * lax.rsqrt(var + EPS)
        shift = be - mu * scale
        h = h * scale + shift
        return jnp.where(h >= 0, h, NEG_SLOPE * h)

    x = x_ref[...]                                                  # bf16
    h = jnp.dot(x, w1_ref[...], preferred_element_type=jnp.float32)
    h = bn_lrelu(h, g1_ref[...], be1_ref[...])

    # Re-zero the padded batch rows (they became lrelu(shift1) above) so they
    # contribute nothing to bn2's statistics.  One VPU select per element.
    row_ids = lax.broadcasted_iota(jnp.int32, h.shape, 0)
    h = jnp.where(row_ids < n, h, 0.0)

    h = jnp.dot(h.astype(jnp.bfloat16), w2_ref[...],
                preferred_element_type=jnp.float32)
    h = bn_lrelu(h, g2_ref[...], be2_ref[...])
    # (No masking needed here: the head is per-row; garbage padded rows are
    #  sliced away by the wrapper.)

    out = jnp.dot(h.astype(jnp.bfloat16), w3_ref[...],
                  preferred_element_type=jnp.float32) + b3_ref[...]
    o_ref[...] = out.astype(o_ref.dtype)


def _round_up(n, m):
    return ((n + m - 1) // m) * m


def _batch_bucket(b):
    """Next power of two, at least one sublane group."""
    return max(SUBLANE, 1 << (b - 1).bit_length())


def _pad2(a, rows, cols, dtype):
    """Zero-pad a 2-D array to (rows, cols) and cast to dtype."""
    out = jnp.zeros((rows, cols), dtype)
    return out.at[: a.shape[0], : a.shape[1]].set(a.astype(dtype))


def prepare_params(params):
    """One-time padding + bf16 cast of the weights (hoisted out of the
    per-call path).  params: dict from init_params (torch layout, transposed
    weights).  fc1/fc2 biases (b1/b2) are intentionally dropped: a Linear bias
    followed by batch-stat BatchNorm is mathematically cancelled."""
    dim_in = params["w1"].shape[0]
    dim_act = params["w3"].shape[1]
    d_in_pad = _round_up(max(dim_in, LANE), LANE)
    a_pad = _round_up(max(dim_act, LANE), LANE)
    return {
        "dim_in": dim_in, "dim_act": dim_act,
        "d_in_pad": d_in_pad, "a_pad": a_pad,
        "w1": _pad2(params["w1"], d_in_pad, HIDDEN_PAD, jnp.bfloat16),
        "w2": _pad2(params["w2"], HIDDEN_PAD, HIDDEN_PAD, jnp.bfloat16),
        "w3": _pad2(params["w3"], HIDDEN_PAD, a_pad, jnp.bfloat16),
        "g1": _pad2(params["g1"], 1, HIDDEN_PAD, jnp.float32),
        "be1": _pad2(params["be1"], 1, HIDDEN_PAD, jnp.float32),
        "g2": _pad2(params["g2"], 1, HIDDEN_PAD, jnp.float32),
        "be2": _pad2(params["be2"], 1, HIDDEN_PAD, jnp.float32),
        "b3": _pad2(params["b3"], 1, a_pad, jnp.float32),
    }


@jax.jit
def _forward_padded(n_arr, xp, w1, g1, be1, w2, g2, be2, w3, b3):
    """One Mosaic/XLA compile per batch bucket (shapes only; batch size is a
    runtime SMEM scalar)."""
    b_pad, d_in_pad = xp.shape
    hid = w1.shape[1]
    a_pad = w3.shape[1]
    tensor_inputs = (xp, w1, g1, be1, w2, g2, be2, w3, b3)

    def full_spec(a):
        nd = a.ndim
        return pl.BlockSpec(a.shape, lambda *_, nd=nd: (0,) * nd)

    flops = 2 * b_pad * (d_in_pad * hid + hid * hid + hid * a_pad)
    bytes_accessed = (sum(int(a.size) * a.dtype.itemsize for a in tensor_inputs)
                      + b_pad * a_pad * 4)

    # VMEM budget derived from the actual block sizes: 2x (pipelined) inputs +
    # output, plus the live f32/bf16 copies of the (b_pad, hid) activation,
    # clamped to stay comfortably under v7x's 64 MiB physical VMEM.
    interm_bytes = b_pad * hid * (3 * 4 + 2 * 2)
    vmem_limit = 2 * bytes_accessed + 2 * interm_bytes + (4 << 20)
    vmem_limit = int(min(max(vmem_limit, 32 << 20), 48 << 20))

    return pl.pallas_call(
        _mlp_kernel,
        out_shape=jax.ShapeDtypeStruct((b_pad, a_pad), jnp.float32),
        grid_spec=pltpu.PrefetchScalarGridSpec(
            num_scalar_prefetch=1,          # real batch size -> SMEM
            grid=(1,),
            in_specs=[full_spec(a) for a in tensor_inputs],
            out_specs=pl.BlockSpec((b_pad, a_pad), lambda *_: (0, 0)),
        ),
        compiler_params=pltpu.CompilerParams(
            dimension_semantics=("arbitrary",),
            vmem_limit_bytes=vmem_limit),
        cost_estimate=pl.CostEstimate(
            flops=flops,
            transcendentals=2 * hid,
            bytes_accessed=bytes_accessed),
    )(n_arr, *tensor_inputs)


def mlp_forward(x, prepped):
    """x: (B, dim_in) f32.  prepped: dict from prepare_params."""
    B, dim_in = x.shape
    assert dim_in == prepped["dim_in"]
    b_pad = _batch_bucket(B)
    # Per-call work is only this pad+cast of x; padded rows/cols are zero so
    # results are unchanged (fc1 has no bias).
    xp = jnp.pad(x.astype(jnp.bfloat16),
                 ((0, b_pad - B), (0, prepped["d_in_pad"] - dim_in)))
    n_arr = jnp.full((1,), B, jnp.int32)
    out = _forward_padded(n_arr, xp,
                          prepped["w1"], prepped["g1"], prepped["be1"],
                          prepped["w2"], prepped["g2"], prepped["be2"],
                          prepped["w3"], prepped["b3"])
    return out[:B, : prepped["dim_act"]]


def init_params(key, dim_in, dim_act):
    """Torch nn.Linear default init; weights stored transposed, i.e. (in, out)."""
    ks = jax.random.split(key, 6)
    s1 = 1.0 / jnp.sqrt(dim_in)
    s2 = 1.0 / jnp.sqrt(HIDDEN)
    return {
        "w1": jax.random.uniform(ks[0], (dim_in, HIDDEN), jnp.float32, -s1, s1),
        "b1": jax.random.uniform(ks[1], (1, HIDDEN), jnp.float32, -s1, s1),
        "g1": jnp.ones((1, HIDDEN), jnp.float32),      # bn1 weight
        "be1": jnp.zeros((1, HIDDEN), jnp.float32),    # bn1 bias
        "w2": jax.random.uniform(ks[2], (HIDDEN, HIDDEN), jnp.float32, -s2, s2),
        "b2": jax.random.uniform(ks[3], (1, HIDDEN), jnp.float32, -s2, s2),
        "g2": jnp.ones((1, HIDDEN), jnp.float32),
        "be2": jnp.zeros((1, HIDDEN), jnp.float32),
        "w3": jax.random.uniform(ks[4], (HIDDEN, dim_act), jnp.float32, -s2, s2),
        "b3": jax.random.uniform(ks[5], (1, dim_act), jnp.float32, -s2, s2),
    }


def _lrelu(h):
    return jnp.where(h >= 0, h, NEG_SLOPE * h)


def mlp_reference_f32(x, p):
    """Straight f32 port of the PyTorch module (training-mode BN, with biases)."""
    def bn(h, g, be):
        mu = jnp.mean(h, axis=0, keepdims=True)
        var = jnp.var(h, axis=0, keepdims=True)        # biased variance
        return (h - mu) * lax.rsqrt(var + EPS) * g + be

    h = _lrelu(bn(x @ p["w1"] + p["b1"], p["g1"], p["be1"]))
    h = _lrelu(bn(h @ p["w2"] + p["b2"], p["g2"], p["be2"]))
    return h @ p["w3"] + p["b3"]


def mlp_reference_bf16(x, p):
    """Numerics model of the kernel: bf16 matmuls with f32 accumulation,
    bias-free fc1/fc2, one-pass folded BN."""
    def bn(h, g, be):
        mu = jnp.mean(h, axis=0, keepdims=True)
        var = jnp.mean(h * h, axis=0, keepdims=True) - mu * mu
        scale = g * lax.rsqrt(var + EPS)
        return h * scale + (be - mu * scale)

    bf = jnp.bfloat16
    h = jnp.dot(x.astype(bf), p["w1"].astype(bf),
                preferred_element_type=jnp.float32)
    h = _lrelu(bn(h, p["g1"], p["be1"]))
    h = jnp.dot(h.astype(bf), p["w2"].astype(bf),
                preferred_element_type=jnp.float32)
    h = _lrelu(bn(h, p["g2"], p["be2"]))
    return jnp.dot(h.astype(bf), p["w3"].astype(bf),
                   preferred_element_type=jnp.float32) + p["b3"]


if __name__ == "__main__":
    key = jax.random.PRNGKey(0)
    k_x, k_p = jax.random.split(key)

    dim_in, dim_act = 32, 4
    params = init_params(k_p, dim_in, dim_act)
    prepped = prepare_params(params)       # one-time padding / bf16 cast

    # B=6 (not a multiple of 8) exercises the padded-row masking path;
    # B=12 exercises a second batch bucket.
    for B in (6, 12):
        xb = jax.random.normal(jax.random.fold_in(k_x, B), (B, dim_in),
                               jnp.float32)
        out = mlp_forward(xb, prepped)
        jax.block_until_ready(out)
        assert out.shape == (B, dim_act)

        # Tight check against a reference modelling the kernel's exact numerics.
        ref_bf16 = mlp_reference_bf16(xb, params)
        assert jnp.allclose(out, ref_bf16, atol=2e-3, rtol=2e-3), \
            f"B={B}: mismatch vs bf16-matmul reference"

        # Loose check against the full-f32 PyTorch-semantics reference
        # (only bf16 weight/activation rounding separates the two).
        ref_f32 = mlp_reference_f32(xb, params)
        assert jnp.allclose(out, ref_f32, atol=5e-2, rtol=5e-2), \
            f"B={B}: mismatch vs f32 reference"

    print("KERNEL_OK")
</pallas_src>

<mosaic_0001>
module attributes {stable_mosaic.version = 11 : i64} {
  func.func @_mlp_kernel(%arg0: i32, %arg1: memref<1xi32, #tpu.memory_space<smem>>, %arg2: memref<8x128xbf16, #tpu.memory_space<vmem>>, %arg3: memref<128x256xbf16, #tpu.memory_space<vmem>>, %arg4: memref<1x256xf32, #tpu.memory_space<vmem>>, %arg5: memref<1x256xf32, #tpu.memory_space<vmem>>, %arg6: memref<256x256xbf16, #tpu.memory_space<vmem>>, %arg7: memref<1x256xf32, #tpu.memory_space<vmem>>, %arg8: memref<1x256xf32, #tpu.memory_space<vmem>>, %arg9: memref<256x128xbf16, #tpu.memory_space<vmem>>, %arg10: memref<1x128xf32, #tpu.memory_space<vmem>>, %arg11: memref<8x128xf32, #tpu.memory_space<vmem>>) attributes {dimension_semantics = [#tpu.dimension_semantics<arbitrary>], iteration_bounds = array<i64: 1>, scalar_prefetch = 1 : i64, scratch_operands = 0 : i64, tpu.core_type = #tpu.core_type<tc>, window_params = [{pipeline_mode = #tpu.pipeline_mode<synchronous>, transform_indices = @transform_0, window_bounds = array<i64: 8, 128>}, {pipeline_mode = #tpu.pipeline_mode<synchronous>, transform_indices = @transform_1, window_bounds = array<i64: 128, 256>}, {pipeline_mode = #tpu.pipeline_mode<synchronous>, transform_indices = @transform_2, window_bounds = array<i64: 1, 256>}, {pipeline_mode = #tpu.pipeline_mode<synchronous>, transform_indices = @transform_3, window_bounds = array<i64: 1, 256>}, {pipeline_mode = #tpu.pipeline_mode<synchronous>, transform_indices = @transform_4, window_bounds = array<i64: 256, 256>}, {pipeline_mode = #tpu.pipeline_mode<synchronous>, transform_indices = @transform_5, window_bounds = array<i64: 1, 256>}, {pipeline_mode = #tpu.pipeline_mode<synchronous>, transform_indices = @transform_6, window_bounds = array<i64: 1, 256>}, {pipeline_mode = #tpu.pipeline_mode<synchronous>, transform_indices = @transform_7, window_bounds = array<i64: 256, 128>}, {pipeline_mode = #tpu.pipeline_mode<synchronous>, transform_indices = @transform_8, window_bounds = array<i64: 1, 128>}, {pipeline_mode = #tpu.pipeline_mode<synchronous>, transform_indices = @transform_9, window_bounds = array<i64: 8, 128>}]} {
    %c0 = arith.constant 0 : index
    %0 = memref.load %arg1[%c0] : memref<1xi32, #tpu.memory_space<smem>>
    %1 = arith.sitofp %0 : i32 to f32
    %cst = arith.constant 1.000000e+00 : f32
    %2 = arith.divf %cst, %1 : f32
    %c0_0 = arith.constant 0 : index
    %c0_1 = arith.constant 0 : index
    %3 = vector.load %arg2[%c0_0, %c0_1] : memref<8x128xbf16, #tpu.memory_space<vmem>>, vector<8x128xbf16>
    %c0_2 = arith.constant 0 : index
    %c0_3 = arith.constant 0 : index
    %4 = vector.load %arg3[%c0_2, %c0_3] : memref<128x256xbf16, #tpu.memory_space<vmem>>, vector<128x256xbf16>
    %cst_4 = arith.constant dense<0.000000e+00> : vector<8x256xf32>
    %5 = tpu.matmul %3, %4, %cst_4 {dimension_numbers = #tpu.dot_dimension_numbers<[1], [0], [0], [1], [0, 0, 1, 1], [], []>} : vector<8x128xbf16>, vector<128x256xbf16>, vector<8x256xf32> -> vector<8x256xf32>
    %c0_5 = arith.constant 0 : index
    %c0_6 = arith.constant 0 : index
    %6 = vector.load %arg4[%c0_5, %c0_6] : memref<1x256xf32, #tpu.memory_space<vmem>>, vector<1x256xf32>
    %c0_7 = arith.constant 0 : index
    %c0_8 = arith.constant 0 : index
    %7 = vector.load %arg5[%c0_7, %c0_8] : memref<1x256xf32, #tpu.memory_space<vmem>>, vector<1x256xf32>
    %cst_9 = arith.constant dense<0.000000e+00> : vector<256xf32>
    %8 = vector.multi_reduction <add>, %5, %cst_9 [0] : vector<8x256xf32> to vector<256xf32>
    %9 = vector.shape_cast %8 : vector<256xf32> to vector<1x256xf32>
    %10 = arith.mulf %5, %5 : vector<8x256xf32>
    %cst_10 = arith.constant dense<0.000000e+00> : vector<256xf32>
    %11 = vector.multi_reduction <add>, %10, %cst_10 [0] : vector<8x256xf32> to vector<256xf32>
    %12 = vector.shape_cast %11 : vector<256xf32> to vector<1x256xf32>
    %13 = vector.broadcast %2 : f32 to vector<1x256xf32>
    %14 = arith.mulf %9, %13 : vector<1x256xf32>
    %15 = vector.broadcast %2 : f32 to vector<1x256xf32>
    %16 = arith.mulf %12, %15 : vector<1x256xf32>
    %17 = arith.mulf %14, %14 : vector<1x256xf32>
    %18 = arith.subf %16, %17 : vector<1x256xf32>
    %cst_11 = arith.constant 9.99999974E-6 : f32
    %19 = vector.broadcast %cst_11 : f32 to vector<1x256xf32>
    %20 = arith.addf %18, %19 : vector<1x256xf32>
    %21 = math.rsqrt %20 : vector<1x256xf32>
    %22 = arith.mulf %6, %21 : vector<1x256xf32>
    %23 = arith.mulf %14, %22 : vector<1x256xf32>
    %24 = arith.subf %7, %23 : vector<1x256xf32>
    %25 = vector.broadcast %22 : vector<1x256xf32> to vector<8x256xf32>
    %26 = arith.mulf %5, %25 : vector<8x256xf32>
    %27 = vector.broadcast %24 : vector<1x256xf32> to vector<8x256xf32>
    %28 = arith.addf %26, %27 : vector<8x256xf32>
    %cst_12 = arith.constant 0.000000e+00 : f32
    %29 = vector.broadcast %cst_12 : f32 to vector<8x256xf32>
    %30 = arith.cmpf oge, %28, %29 : vector<8x256xf32>
    %cst_13 = arith.constant 0.00999999977 : f32
    %31 = vector.broadcast %cst_13 : f32 to vector<8x256xf32>
    %32 = arith.mulf %31, %28 : vector<8x256xf32>
    %33 = arith.select %30, %28, %32 : vector<8x256xi1>, vector<8x256xf32>
    %34 = tpu.iota {dimensions = array<i32: 0>} : vector<8x256xi32>
    %35 = vector.broadcast %0 : i32 to vector<8x256xi32>
    %36 = arith.cmpi slt, %34, %35 : vector<8x256xi32>
    %cst_14 = arith.constant 0.000000e+00 : f32
    %37 = vector.broadcast %cst_14 : f32 to vector<8x256xf32>
    %38 = arith.select %36, %33, %37 : vector<8x256xi1>, vector<8x256xf32>
    %39 = arith.truncf %38 : vector<8x256xf32> to vector<8x256xbf16>
    %c0_15 = arith.constant 0 : index
    %c0_16 = arith.constant 0 : index
    %40 = vector.load %arg6[%c0_15, %c0_16] : memref<256x256xbf16, #tpu.memory_space<vmem>>, vector<256x256xbf16>
    %cst_17 = arith.constant dense<0.000000e+00> : vector<8x256xf32>
    %41 = tpu.matmul %39, %40, %cst_17 {dimension_numbers = #tpu.dot_dimension_numbers<[1], [0], [0], [1], [0, 0, 1, 1], [], []>} : vector<8x256xbf16>, vector<256x256xbf16>, vector<8x256xf32> -> vector<8x256xf32>
    %c0_18 = arith.constant 0 : index
    %c0_19 = arith.constant 0 : index
    %42 = vector.load %arg7[%c0_18, %c0_19] : memref<1x256xf32, #tpu.memory_space<vmem>>, vector<1x256xf32>
    %c0_20 = arith.constant 0 : index
    %c0_21 = arith.constant 0 : index
    %43 = vector.load %arg8[%c0_20, %c0_21] : memref<1x256xf32, #tpu.memory_space<vmem>>, vector<1x256xf32>
    %cst_22 = arith.constant dense<0.000000e+00> : vector<256xf32>
    %44 = vector.multi_reduction <add>, %41, %cst_22 [0] : vector<8x256xf32> to vector<256xf32>
    %45 = vector.shape_cast %44 : vector<256xf32> to vector<1x256xf32>
    %46 = arith.mulf %41, %41 : vector<8x256xf32>
    %cst_23 = arith.constant dense<0.000000e+00> : vector<256xf32>
    %47 = vector.multi_reduction <add>, %46, %cst_23 [0] : vector<8x256xf32> to vector<256xf32>
    %48 = vector.shape_cast %47 : vector<256xf32> to vector<1x256xf32>
    %49 = vector.broadcast %2 : f32 to vector<1x256xf32>
    %50 = arith.mulf %45, %49 : vector<1x256xf32>
    %51 = vector.broadcast %2 : f32 to vector<1x256xf32>
    %52 = arith.mulf %48, %51 : vector<1x256xf32>
    %53 = arith.mulf %50, %50 : vector<1x256xf32>
    %54 = arith.subf %52, %53 : vector<1x256xf32>
    %cst_24 = arith.constant 9.99999974E-6 : f32
    %55 = vector.broadcast %cst_24 : f32 to vector<1x256xf32>
    %56 = arith.addf %54, %55 : vector<1x256xf32>
    %57 = math.rsqrt %56 : vector<1x256xf32>
    %58 = arith.mulf %42, %57 : vector<1x256xf32>
    %59 = arith.mulf %50, %58 : vector<1x256xf32>
    %60 = arith.subf %43, %59 : vector<1x256xf32>
    %61 = vector.broadcast %58 : vector<1x256xf32> to vector<8x256xf32>
    %62 = arith.mulf %41, %61 : vector<8x256xf32>
    %63 = vector.broadcast %60 : vector<1x256xf32> to vector<8x256xf32>
    %64 = arith.addf %62, %63 : vector<8x256xf32>
    %cst_25 = arith.constant 0.000000e+00 : f32
    %65 = vector.broadcast %cst_25 : f32 to vector<8x256xf32>
    %66 = arith.cmpf oge, %64, %65 : vector<8x256xf32>
    %cst_26 = arith.constant 0.00999999977 : f32
    %67 = vector.broadcast %cst_26 : f32 to vector<8x256xf32>
    %68 = arith.mulf %67, %64 : vector<8x256xf32>
    %69 = arith.select %66, %64, %68 : vector<8x256xi1>, vector<8x256xf32>
    %70 = arith.truncf %69 : vector<8x256xf32> to vector<8x256xbf16>
    %c0_27 = arith.constant 0 : index
    %c0_28 = arith.constant 0 : index
    %71 = vector.load %arg9[%c0_27, %c0_28] : memref<256x128xbf16, #tpu.memory_space<vmem>>, vector<256x128xbf16>
    %cst_29 = arith.constant dense<0.000000e+00> : vector<8x128xf32>
    %72 = tpu.matmul %70, %71, %cst_29 {dimension_numbers = #tpu.dot_dimension_numbers<[1], [0], [0], [1], [0, 0, 1, 1], [], []>} : vector<8x256xbf16>, vector<256x128xbf16>, vector<8x128xf32> -> vector<8x128xf32>
    %c0_30 = arith.constant 0 : index
    %c0_31 = arith.constant 0 : index
    %73 = vector.load %arg10[%c0_30, %c0_31] : memref<1x128xf32, #tpu.memory_space<vmem>>, vector<1x128xf32>
    %74 = vector.broadcast %73 : vector<1x128xf32> to vector<8x128xf32>
    %75 = arith.addf %72, %74 : vector<8x128xf32>
    %c0_32 = arith.constant 0 : index
    %c0_33 = arith.constant 0 : index
    %76 = vector.load %arg11[%c0_32, %c0_33] : memref<8x128xf32, #tpu.memory_space<vmem>>, vector<8x128xf32>
    tpu.vector_store %arg11[%c0_32, %c0_33], %75 {strides = array<i32>} : memref<8x128xf32, #tpu.memory_space<vmem>>, vector<8x128xf32>,
    return
  }
  func.func @transform_0(%arg0: i32, %arg1: memref<1xi32, #tpu.memory_space<smem>>) -> (i32, i32) {
    %c0_i32 = arith.constant 0 : i32
    %c0_i32_0 = arith.constant 0 : i32
    %c0_i32_1 = arith.constant 0 : i32
    return %c0_i32, %c0_i32_0 : i32, i32
  }
  func.func @transform_1(%arg0: i32, %arg1: memref<1xi32, #tpu.memory_space<smem>>) -> (i32, i32) {
    %c0_i32 = arith.constant 0 : i32
    %c0_i32_0 = arith.constant 0 : i32
    %c0_i32_1 = arith.constant 0 : i32
    return %c0_i32, %c0_i32_0 : i32, i32
  }
  func.func @transform_2(%arg0: i32, %arg1: memref<1xi32, #tpu.memory_space<smem>>) -> (i32, i32) {
    %c0_i32 = arith.constant 0 : i32
    %c0_i32_0 = arith.constant 0 : i32
    %c0_i32_1 = arith.constant 0 : i32
    return %c0_i32, %c0_i32_0 : i32, i32
  }
  func.func @transform_3(%arg0: i32, %arg1: memref<1xi32, #tpu.memory_space<smem>>) -> (i32, i32) {
    %c0_i32 = arith.constant 0 : i32
    %c0_i32_0 = arith.constant 0 : i32
    %c0_i32_1 = arith.constant 0 : i32
    return %c0_i32, %c0_i32_0 : i32, i32
  }
  func.func @transform_4(%arg0: i32, %arg1: memref<1xi32, #tpu.memory_space<smem>>) -> (i32, i32) {
    %c0_i32 = arith.constant 0 : i32
    %c0_i32_0 = arith.constant 0 : i32
    %c0_i32_1 = arith.constant 0 : i32
    return %c0_i32, %c0_i32_0 : i32, i32
  }
  func.func @transform_5(%arg0: i32, %arg1: memref<1xi32, #tpu.memory_space<smem>>) -> (i32, i32) {
    %c0_i32 = arith.constant 0 : i32
    %c0_i32_0 = arith.constant 0 : i32
    %c0_i32_1 = arith.constant 0 : i32
    return %c0_i32, %c0_i32_0 : i32, i32
  }
  func.func @transform_6(%arg0: i32, %arg1: memref<1xi32, #tpu.memory_space<smem>>) -> (i32, i32) {
    %c0_i32 = arith.constant 0 : i32
    %c0_i32_0 = arith.constant 0 : i32
    %c0_i32_1 = arith.constant 0 : i32
    return %c0_i32, %c0_i32_0 : i32, i32
  }
  func.func @transform_7(%arg0: i32, %arg1: memref<1xi32, #tpu.memory_space<smem>>) -> (i32, i32) {
    %c0_i32 = arith.constant 0 : i32
    %c0_i32_0 = arith.constant 0 : i32
    %c0_i32_1 = arith.constant 0 : i32
    return %c0_i32, %c0_i32_0 : i32, i32
  }
  func.func @transform_8(%arg0: i32, %arg1: memref<1xi32, #tpu.memory_space<smem>>) -> (i32, i32) {
    %c0_i32 = arith.constant 0 : i32
    %c0_i32_0 = arith.constant 0 : i32
    %c0_i32_1 = arith.constant 0 : i32
    return %c0_i32, %c0_i32_0 : i32, i32
  }
  func.func @transform_9(%arg0: i32, %arg1: memref<1xi32, #tpu.memory_space<smem>>) -> (i32, i32) {
    %c0_i32 = arith.constant 0 : i32
    %c0_i32_0 = arith.constant 0 : i32
    %c0_i32_1 = arith.constant 0 : i32
    return %c0_i32, %c0_i32_0 : i32, i32
  }
}

</mosaic_0001>

<bundles_post_ra>
// kernel: _forward_padded.1
= control target key start
LH: loop header
LB: loop body
LE: loop exit
PB: predicated region body
PF: predicated region fallthrough
CT: control target
= control target key end

     0   :  { %16 = vsyncpa [#allocation5], 0  ;;  %s1533_s0 = inlined_call_operand.<no memory space> [shape: s32[1], index: 0, kind: input, shape index: {}]   ;;  %s1534_s1 = inlined_call_operand.hbm [shape: bf16[8,128], index: 1, kind: input, shape index: {}]   ;;  %s1535_s2 = inlined_call_operand.hbm [shape: bf16[128,256], index: 2, kind: input, shape index: {}]   ;;  %s1536_s3 = inlined_call_operand.vmem [shape: f32[1,256], index: 3, kind: input, shape index: {}]   ;;  %s1537_s4 = inlined_call_operand.vmem [shape: f32[1,256], index: 4, kind: input, shape index: {}]   ;;  %s1538_s5 = inlined_call_operand.hbm [shape: bf16[256,256], index: 5, kind: input, shape index: {}]   ;;  %s1539_s6 = inlined_call_operand.vmem [shape: f32[1,256], index: 6, kind: input, shape index: {}]   ;;  %s1540_s7 = inlined_call_operand.hbm [shape: f32[1,256], index: 7, kind: input, shape index: {}]   ;;  %s1541_s8 = inlined_call_operand.hbm [shape: bf16[256,128], index: 8, kind: input, shape index: {}]   ;;  %s1542_s9 = inlined_call_operand.vmem [shape: f32[1,128], index: 9, kind: input, shape index: {}]   ;;  %s1543_s10 = inlined_call_operand.hbm [shape: f32[8,128], index: 10, kind: output, shape index: {}]  }
   0x1   :  { %17 = vsyncpa [#allocation8], 0 }
   0x2   :  { %18 = vsyncpa [#allocation11], 0  ;;  %s35_s15 = sshll.u32 %s1535_s2, 4  ;;  %s36_s15 = int_to_ptr.hbm [resolvable:$true] %s35_s15 }
   0x3   :  { %19 = vsyncpa [#allocation6], 0  ;;  %s1375_s16 = smov [#allocation7]   ;;  %s68_s20 = sshll.u32 %s1540_s7, 4  ;;  %s69_s20 = int_to_ptr.hbm [resolvable:$true] %s68_s20 }
   0x4   :  { %s37_s17 = sshll.u32 %s1375_s16, 4  ;;  %s1376_s21 = smov 128   ;;  %s38_s17 = int_to_ptr.vmem [resolvable:$true] %s37_s17 }
   0x5   :  { %s1377_s22 = smov 8   ;;  %s1378_s23 = smov [#allocation10]  }
   0x6   :  { %43 = dma.hbm_to_vmem [thread:$0]  %s36_s15, 2048, %s38_s17, [#allocation8], %s1376_s21, %s1376_s21, %s1377_s22  }
   0x7   :  { %s70_s24 = sshll.u32 %s1378_s23, 4  ;;  %s25_s27 = sshll.u32 %s1534_s1, 4  ;;  %s71_s24 = int_to_ptr.vmem [resolvable:$true] %s70_s24  ;;  %s26_s27 = int_to_ptr.hbm [resolvable:$true] %s25_s27 }
   0x8   :  { %73 = dma.hbm_to_vmem [thread:$0]  %s69_s20, 32, %s71_s24, [#allocation11]  }
   0x9   :  { %s52_s29 = sshll.u32 %s1538_s5, 4  ;;  %s1379_s30 = smov [#allocation4]   ;;  %s53_s29 = int_to_ptr.hbm [resolvable:$true] %s52_s29 }
   0xa   :  { %s27_s11 = sshll.u32 %s1379_s30, 4  ;;  %s1380_s7 = smov [#allocation9]   ;;  %s28_s11 = int_to_ptr.vmem [resolvable:$true] %s27_s11 }
   0xb   :  { %30 = dma.hbm_to_vmem [thread:$0]  %s26_s27, 64, %s28_s11, [#allocation5]  }
   0xc   :  { %s54_s12 = sshll.u32 %s1380_s7, 4  ;;  %s78_s15 = sshll.u32 %s1541_s8, 4  ;;  %s55_s12 = int_to_ptr.vmem [resolvable:$true] %s54_s12  ;;  %s79_s15 = int_to_ptr.hbm [resolvable:$true] %s78_s15 }
   0xd   :  { %60 = dma.hbm_to_vmem [thread:$0]  %s53_s29, 4096, %s55_s12, [#allocation8], %s1376_s21, %s1376_s21, %s1377_s22  }
   0xe   :  { %s1381_s1 = smov [#allocation12]   ;;  %s1382_s17 = smov 64  }
   0xf   :  { %s80_s16 = sshll.u32 %s1381_s1, 4  ;;  %s1383_s18 = smov 4   ;;  %s81_s16 = int_to_ptr.vmem [resolvable:$true] %s80_s16 }
  0x10   :  { %86 = dma.hbm_to_vmem [thread:$0]  %s79_s15, 2048, %s81_s16, [#allocation11], %s1382_s17, %s1382_s17, %s1383_s18  }
  0x11   :  { %1367 = dma.done.wait [#allocation5], 64  }
  0x12   :  { %1368 = vsyncadd [#allocation5], 4294967232 }
  0x13   :  { %1369 = dma.done.wait [#allocation8], 6144  }
  0x14   :  { %1370 = vsyncadd [#allocation8], 4294961152 }
  0x15   :  { %1371 = dma.done.wait [#allocation11], 2080  }
  0x16   :  { %1372 = vsyncadd [#allocation11], 4294965216  ;;  %s110_s20 = scvt.s32.f32 %s1533_s0  ;;  %v926_v0 = vld [vmem:[#allocation7 + $0x70] sm:$0xf]  ;;  %v1151_v1 = vld [vmem:[#allocation7 + $0x74] sm:$0xf0] }
  0x17   :  { %v1150_v2 = vld [vmem:[#allocation7 + $0x74] sm:$0xf]  ;;  %v927_v3 = vor.u32 %v1151_v1, %v926_v0  ;;  %v928_v4 = vld [vmem:[#allocation7 + $0x78] sm:$0xf0]  ;;  %v918_v5 = vld [vmem:[#allocation7 + $0x60] sm:$0xf] }
  0x18   :  { %v1149_v6 = vld [vmem:[#allocation7 + $0x64] sm:$0xf0]  ;;  %v931_v7 = vor.u32 %v1150_v2, %v928_v4  ;;  %v1148_v8 = vld [vmem:[#allocation7 + $0x64] sm:$0xf]  ;;  %v920_v9 = vld [vmem:[#allocation7 + $0x68] sm:$0xf0]  ;;  %v111_v11 = vstv %s110_s20 }
  0x19   :  { %224 = vmatpush.bf16.msra.mxu0 %v927_v3  ;;  %v919_v10 = vor.u32 %v1149_v6, %v918_v5  ;;  %v923_v12 = vor.u32 %v1148_v8, %v920_v9  ;;  %v910_v13 = vld [vmem:[#allocation7 + $0x50] sm:$0xf]  ;;  %v1147_v14 = vld [vmem:[#allocation7 + $0x54] sm:$0xf0]  ;;  %1213 = vrcp.f32 %v111_v11  ;;  %v1146_v15 = vld [vmem:[#allocation7 + $0x54] sm:$0xf]  ;;  %vm117_vm0 = vweird.f32 %v111_v11 }
  0x1a   :  { %237 = vmatpush.bf16.msra.mxu1 %v931_v7  ;;  %v912_v16 = vld [vmem:[#allocation7 + $0x58] sm:$0xf0]  ;;  %v911_v17 = vor.u32 %v1147_v14, %v910_v13  ;;  %v902_v19 = vld [vmem:[#allocation7 + $0x40] sm:$0xf]  ;;  %v1145_v20 = vld [vmem:[#allocation7 + $0x44] sm:$0xf0] }
  0x1b   :  { %v915_v18 = vor.u32 %v1146_v15, %v912_v16  ;;  %v1144_v21 = vld [vmem:[#allocation7 + $0x44] sm:$0xf]  ;;  %v904_v22 = vld [vmem:[#allocation7 + $0x48] sm:$0xf0]  ;;  %v903_v24 = vor.u32 %v1145_v20, %v902_v19  ;;  %v894_v25 = vld [vmem:[#allocation7 + $0x30] sm:$0xf] }
  0x1c   :  { %v907_v27 = vor.u32 %v1144_v21, %v904_v22  ;;  %v1143_v28 = vld [vmem:[#allocation7 + $0x34] sm:$0xf0]  ;;  %v1142_v29 = vld [vmem:[#allocation7 + $0x34] sm:$0xf]  ;;  %v123_v30 = vand.u32 2147483648, %v111_v11  ;;  %vm312_vm9 = vcmask 1040384  }
  0x1d   :  { %225 = vmatpush.bf16.msra.mxu0 %v919_v10  ;;  %v896_v31 = vld [vmem:[#allocation7 + $0x38] sm:$0xf0]  ;;  %v121_v33 = vand.u32 2147483647, %v111_v11  ;;  %v895_v34 = vor.u32 %v1143_v28, %v894_v25  ;;  %v886_v37 = vld [vmem:[#allocation7 + $0x20] sm:$0xf] }
  0x1e   :  { %238 = vmatpush.bf16.msra.mxu1 %v923_v12  ;;  %v899_v36 = vor.u32 %v1142_v29, %v896_v31  ;;  %v1141_v38 = vld [vmem:[#allocation7 + $0x24] sm:$0xf0]  ;;  %v124_v39 = vor.u32 1.1754944e-38, %v123_v30  ;;  %v1140_v40 = vld [vmem:[#allocation7 + $0x24] sm:$0xf]  ;;  %s1384_s27 = smov [#allocation13]  }
  0x1f   :  { %v1214_v23 = vpop.eup %1213  ;;  %v888_v41 = vld [vmem:[#allocation7 + $0x28] sm:$0xf0]  ;;  %vm122_vm3 = vcmp.eq.f32.partialorder %v121_v33, 8.507059e+37  ;;  %v887_v43 = vor.u32 %v1141_v38, %v886_v37  ;;  %v878_v46 = vld [vmem:[#allocation7 + $0x10] sm:$0xf]  ;;  %s854_s2 = sshll.u32 %s1384_s27, 4  ;;  %s855_s2 = int_to_ptr.vmem [resolvable:$true] %s854_s2 }
  0x20   :  { %v113_v26 = vmul.f32 %v1214_v23, %v111_v11  ;;  %vm118_vm1 = vweird.f32 %v1214_v23  ;;  %v891_v45 = vor.u32 %v1140_v40, %v888_v41  ;;  %v1139_v47 = vld [vmem:[#allocation7 + $0x14] sm:$0xf0]  ;;  %v1138_v49 = vld [vmem:[#allocation7 + $0x14] sm:$0xf]  ;;  %v880_v50 = vld [vmem:[#allocation7 + $0x18] sm:$0xf0] }
  0x21   :  { %226 = vmatpush.bf16.msra.mxu0 %v911_v17  ;;  %vm119_vm2 = vmor %vm117_vm0, %vm118_vm1  ;;  %v879_v51 = vor.u32 %v1139_v47, %v878_v46  ;;  %v883_v52 = vor.u32 %v1138_v49, %v880_v50  ;;  %v870_v53 = vld [vmem:[#allocation7] sm:$0xf]  ;;  %v1137_v54 = vld [vmem:[#allocation7 + $0x4] sm:$0xf0]  ;;  %s856_s30 = sshll.u32 %s1543_s10, 4  ;;  %s857_s30 = int_to_ptr.hbm [resolvable:$true] %s856_s30 }
  0x22   :  { %239 = vmatpush.bf16.msra.mxu1 %v915_v18  ;;  %v114_v32 = vsub.f32 1.0, %v113_v26  ;;  %v1136_v55 = vld [vmem:[#allocation7 + $0x4] sm:$0xf]  ;;  %v872_v56 = vld [vmem:[#allocation7 + $0x8] sm:$0xf0]  ;;  %v871_v57 = vor.u32 %v1137_v54, %v870_v53 }
  0x23   :  { %v875_v58 = vor.u32 %v1136_v55, %v872_v56  ;;  %v127_v59 = vld [vmem:[#allocation4] sm:$0xf]  ;;  %v990_v60 = vld [vmem:[#allocation9 + $0x70] sm:$0xf]  ;;  %v1167_v61 = vld [vmem:[#allocation9 + $0x74] sm:$0xf0] }
  0x24   :  { %v115_v35 = vmul.f32 %v1214_v23, %v114_v32  ;;  %v1054_v62 = vld [vmem:[#allocation9 + $0xf0] sm:$0xf]  ;;  %v991_v63 = vor.u32 %v1167_v61, %v990_v60  ;;  %v1183_v0 = vld [vmem:[#allocation9 + $0xf4] sm:$0xf0]  ;;  %v1166_v1 = vld [vmem:[#allocation9 + $0x74] sm:$0xf] }
  0x25   :  { %227 = vmatpush.bf16.msra.mxu0 %v903_v24  ;;  %v992_v2 = vld [vmem:[#allocation9 + $0x78] sm:$0xf0]  ;;  %v1055_v3 = vor.u32 %v1183_v0, %v1054_v62  ;;  %v1182_v5 = vld [vmem:[#allocation9 + $0xf4] sm:$0xf]  ;;  %v982_v12 = vld [vmem:[#allocation9 + $0x60] sm:$0xf] }
  0x26   :  { %240 = vmatpush.bf16.msra.mxu1 %v907_v27  ;;  %v116_v42 = vadd.f32 %v1214_v23, %v115_v35  ;;  %v995_v4 = vor.u32 %v1166_v1, %v992_v2  ;;  %v1056_v6 = vld [vmem:[#allocation9 + $0xf8] sm:$0xf0]  ;;  %544 = vmatpush.bf16.msra.mxu2 %v991_v63  ;;  %v1165_v13 = vld [vmem:[#allocation9 + $0x64] sm:$0xf0]  ;;  %v1046_v17 = vld [vmem:[#allocation9 + $0xe0] sm:$0xf] }
  0x27   :  { %v1059_v8 = vor.u32 %v1182_v5, %v1056_v6  ;;  %557 = vmatpush.bf16.msra.mxu3 %v1055_v3  ;;  %v983_v16 = vor.u32 %v1165_v13, %v982_v12  ;;  %v1181_v18 = vld [vmem:[#allocation9 + $0xe4] sm:$0xf0]  ;;  %v1164_v22 = vld [vmem:[#allocation9 + $0x64] sm:$0xf]  ;;  %v1048_v28 = vld [vmem:[#allocation9 + $0xe8] sm:$0xf0] }
  0x28   :  { %v120_v44 = vsel %vm119_vm2, %v1214_v23, %v116_v42  ;;  %v1047_v21 = vor.u32 %v1181_v18, %v1046_v17  ;;  %v984_v23 = vld [vmem:[#allocation9 + $0x68] sm:$0xf0]  ;;  %v1180_v27 = vld [vmem:[#allocation9 + $0xe4] sm:$0xf]  ;;  %v974_v32 = vld [vmem:[#allocation9 + $0x50] sm:$0xf] }
  0x29   :  { %228 = vmatpush.bf16.msra.mxu0 %v895_v34  ;;  %v125_v48 = vsel %vm122_vm3, %v124_v39, %v120_v44  ;;  %v987_v26 = vor.u32 %v1164_v22, %v984_v23  ;;  %v1051_v31 = vor.u32 %v1180_v27, %v1048_v28  ;;  %v1163_v33 = vld [vmem:[#allocation9 + $0x54] sm:$0xf0]  ;;  %v1038_v37 = vld [vmem:[#allocation9 + $0xd0] sm:$0xf]  ;;  %v1162_v42 = vld [vmem:[#allocation9 + $0x54] sm:$0xf] }
  0x2a   :  { %241 = vmatpush.bf16.msra.mxu1 %v899_v36  ;;  %1200 = vpush %v125_v48  ;;  %545 = vmatpush.bf16.msra.mxu2 %v983_v16  ;;  %v975_v36 = vor.u32 %v1163_v33, %v974_v32  ;;  %v1179_v38 = vld [vmem:[#allocation9 + $0xd4] sm:$0xf0]  ;;  %v1178_v48 = vld [vmem:[#allocation9 + $0xd4] sm:$0xf]  ;;  %v1040_v49 = vld [vmem:[#allocation9 + $0xd8] sm:$0xf0] }
  0x2b   :  { %558 = vmatpush.bf16.msra.mxu3 %v1047_v21  ;;  %v1039_v41 = vor.u32 %v1179_v38, %v1038_v37  ;;  %v1043_v53 = vor.u32 %v1178_v48, %v1040_v49  ;;  %v966_v54 = vld [vmem:[#allocation9 + $0x40] sm:$0xf]  ;;  %v1161_v55 = vld [vmem:[#allocation9 + $0x44] sm:$0xf0]  ;;  %v1160_v1 = vld [vmem:[#allocation9 + $0x44] sm:$0xf] }
  0x2c   :  { %v1030_v60 = vld [vmem:[#allocation9 + $0xc0] sm:$0xf]  ;;  %v1177_v61 = vld [vmem:[#allocation9 + $0xc4] sm:$0xf0]  ;;  %v968_v2 = vld [vmem:[#allocation9 + $0x48] sm:$0xf0] }
  0x2d   :  { %229 = vmatpush.bf16.msra.mxu0 %v887_v43  ;;  %v976_v43 = vld [vmem:[#allocation9 + $0x58] sm:$0xf0]  ;;  %v1031_v0 = vor.u32 %v1177_v61, %v1030_v60  ;;  %v971_v5 = vor.u32 %v1160_v1, %v968_v2  ;;  %v1176_v6 = vld [vmem:[#allocation9 + $0xc4] sm:$0xf]  ;;  %v958_v13 = vld [vmem:[#allocation9 + $0x30] sm:$0xf] }
  0x2e   :  { %242 = vmatpush.bf16.msra.mxu1 %v891_v45  ;;  %546 = vmatpush.bf16.msra.mxu2 %v975_v36  ;;  %v979_v47 = vor.u32 %v1162_v42, %v976_v43  ;;  %v960_v21 = vld [vmem:[#allocation9 + $0x38] sm:$0xf0]  ;;  %v950_v28 = vld [vmem:[#allocation9 + $0x20] sm:$0xf]  ;;  %v1157_v32 = vld [vmem:[#allocation9 + $0x24] sm:$0xf0] }
  0x2f   :  { %559 = vmatpush.bf16.msra.mxu3 %v1039_v41  ;;  %v1024_v27 = vld [vmem:[#allocation9 + $0xb8] sm:$0xf0]  ;;  %v1014_v33 = vld [vmem:[#allocation9 + $0xa0] sm:$0xf]  ;;  %v951_v36 = vor.u32 %v1157_v32, %v950_v28  ;;  %v1156_v38 = vld [vmem:[#allocation9 + $0x24] sm:$0xf] }
  0x30   :  { %v1016_v43 = vld [vmem:[#allocation9 + $0xa8] sm:$0xf0]  ;;  %v1006_v48 = vld [vmem:[#allocation9 + $0x90] sm:$0xf]  ;;  %v1171_v49 = vld [vmem:[#allocation9 + $0x94] sm:$0xf0] }
  0x31   :  { %230 = vmatpush.bf16.msra.mxu0 %v879_v51  ;;  %v1153_v60 = vld [vmem:[#allocation9 + $0x4] sm:$0xf0]  ;;  %v998_v61 = vld [vmem:[#allocation9 + $0x80] sm:$0xf]  ;;  %v936_v1 = vld [vmem:[#allocation9 + $0x8] sm:$0xf0] }
  0x32   :  { %243 = vmatpush.bf16.msra.mxu1 %v883_v52 }
  0x33   :  { %560 = vmatpush.bf16.msra.mxu3 %v1031_v0  ;;  %v1152_v0 = vld [vmem:[#allocation9 + $0x4] sm:$0xf] }
  0x35   :  { %231 = vmatpush.bf16.msra.mxu0 %v871_v57 }
  0x36   :  { %244 = vmatpush.bf16.msra.mxu1 %v875_v58 }
  0x38   :  { %232 = vmatmul.bf16.vlgmr.msra.gmra.mxu0 %v127_v59 }
  0x39   :  { %245 = vmatmul.bf16.vlgmr.msra.gmra.mxu1 %v127_v59  ;;  %570 = vmatpush.bf16.msrb.mxu0 %v995_v4  ;;  %v967_v59 = vor.u32 %v1161_v55, %v966_v54  ;;  %v1007_v54 = vor.u32 %v1171_v49, %v1006_v48  ;;  %v1170_v55 = vld [vmem:[#allocation9 + $0x94] sm:$0xf] }
  0x3a   :  { %583 = vmatpush.bf16.msrb.mxu1 %v1059_v8  ;;  %v1032_v8 = vld [vmem:[#allocation9 + $0xc8] sm:$0xf0] }
  0x3b   :  { %547 = vmatpush.bf16.msra.mxu2 %v967_v59  ;;  %v1035_v12 = vor.u32 %v1176_v6, %v1032_v8  ;;  %v939_v6 = vor.u32 %v1152_v0, %v936_v1  ;;  %v1190_v0 = vld [vmem:[#allocation12 + $0x30] sm:$0xff] }
  0x3c   :  { %v1198_v1 = vld [vmem:[#allocation12 + $0x70] sm:$0xff] }
  0x3d   :  { %571 = vmatpush.bf16.msrb.mxu0 %v987_v26  ;;  %v1174_v26 = vld [vmem:[#allocation9 + $0xb4] sm:$0xf] }
  0x3e   :  { %584 = vmatpush.bf16.msrb.mxu1 %v1051_v31  ;;  %v1027_v31 = vor.u32 %v1174_v26, %v1024_v27 }
  0x41   :  { %572 = vmatpush.bf16.msrb.mxu0 %v979_v47 }
  0x42   :  { %585 = vmatpush.bf16.msrb.mxu1 %v1043_v53  ;;  %v944_v53 = vld [vmem:[#allocation9 + $0x18] sm:$0xf0] }
  0x45   :  { %573 = vmatpush.bf16.msrb.mxu0 %v971_v5 }
  0x46   :  { %586 = vmatpush.bf16.msrb.mxu1 %v1035_v12 }
  0x4a   :  { %587 = vmatpush.bf16.msrb.mxu1 %v1027_v31 }
  0x5b   :  { %s1201_s8 = spop %1200 }
  0x5c   :  { %v1470_v58 = vstv %s1201_s8 }
  0xb5   :  { %v1458_v7 = vpop.f32.mrf.mxu0 }
  0xb6   :  { %v252_v9 = vrot.slane %v1458_v7, 4  ;;  %v264_v10 = vmul.f32 %v1458_v7, %v1458_v7  ;;  %v1463_v11 = vpop.f32.mrf.mxu1 }
  0xb7   :  { %v258_v14 = vrot.slane %v1463_v11, 4  ;;  %v265_v15 = vmul.f32 %v1463_v11, %v1463_v11 }
  0xb8   :  { %v253_v19 = vadd.f32 %v252_v9, %v1458_v7  ;;  %v266_v20 = vrot.slane %v264_v10, 4 }
  0xb9   :  { %v259_v24 = vadd.f32 %v258_v14, %v1463_v11  ;;  %v272_v25 = vrot.slane %v265_v15, 4  ;;  %v1159_v14 = vld [vmem:[#allocation9 + $0x34] sm:$0xf0] }
  0xba   :  { %v254_v29 = vrot.slane %v253_v19, 2  ;;  %v267_v30 = vadd.f32 %v266_v20, %v264_v10  ;;  %v959_v18 = vor.u32 %v1159_v14, %v958_v13  ;;  %v1158_v20 = vld [vmem:[#allocation9 + $0x34] sm:$0xf] }
  0xbb   :  { %v260_v34 = vrot.slane %v259_v24, 2  ;;  %v273_v35 = vadd.f32 %v272_v25, %v265_v15  ;;  %v1022_v15 = vld [vmem:[#allocation9 + $0xb0] sm:$0xf]  ;;  %v963_v25 = vor.u32 %v1158_v20, %v960_v21 }
  0xbc   :  { %v255_v39 = vadd.f32 %v254_v29, %v253_v19  ;;  %v268_v40 = vrot.slane %v267_v30, 2  ;;  %v1175_v19 = vld [vmem:[#allocation9 + $0xb4] sm:$0xf0]  ;;  %548 = vmatpush.bf16.msra.mxu2 %v959_v18 }
  0xbd   :  { %v261_v44 = vadd.f32 %v260_v34, %v259_v24  ;;  %v274_v45 = vrot.slane %v273_v35, 2  ;;  %v235_v46 = vpop.f32.mrf.mxu0  ;;  %v1023_v24 = vor.u32 %v1175_v19, %v1022_v15  ;;  %v1173_v34 = vld [vmem:[#allocation9 + $0xa4] sm:$0xf0]  ;;  %574 = vmatpush.bf16.msrb.mxu0 %v963_v25  ;;  %v250_v25 = vld [vmem:[%s1536_s3] sm:$0x3] }
  0xbe   :  { %v256_v50 = vrot.slane %v255_v39, 1  ;;  %v269_v51 = vadd.f32 %v268_v40, %v267_v30  ;;  %v248_v52 = vpop.f32.mrf.mxu1  ;;  %v1015_v37 = vor.u32 %v1173_v34, %v1014_v33  ;;  %v1172_v40 = vld [vmem:[#allocation9 + $0xa4] sm:$0xf]  ;;  %v251_v33 = vld [vmem:[%s1537_s4] sm:$0x3] }
  0xbf   :  { %v262_v56 = vrot.slane %v261_v44, 1  ;;  %v275_v57 = vadd.f32 %v274_v45, %v273_v35  ;;  %561 = vmatpush.bf16.msra.mxu3 %v1023_v24  ;;  %v1155_v45 = vld [vmem:[#allocation9 + $0x14] sm:$0xf0]  ;;  %v1019_v47 = vor.u32 %v1172_v40, %v1016_v43  ;;  %v1154_v52 = vld [vmem:[#allocation9 + $0x14] sm:$0xf]  ;;  %v346_v40 = vstv %s1533_s0 }
  0xc0   :  { %v257_v62 = vadd.f32 %v256_v50, %v255_v39  ;;  %v270_v63 = vrot.slane %v269_v51, 1  ;;  %v952_v39 = vld [vmem:[#allocation9 + $0x28] sm:$0xf0]  ;;  %549 = vmatpush.bf16.msra.mxu2 %v951_v36  ;;  %v947_v59 = vor.u32 %v1154_v52, %v944_v53  ;;  %v344_v36 = vlaneseq }
  0xc1   :  { %v263_v3 = vadd.f32 %v262_v56, %v261_v44  ;;  %v276_v4 = vrot.slane %v275_v57, 1  ;;  %v955_v42 = vor.u32 %v1156_v38, %v952_v39  ;;  %v942_v44 = vld [vmem:[#allocation9 + $0x10] sm:$0xf]  ;;  %v1008_v56 = vld [vmem:[#allocation9 + $0x98] sm:$0xf0]  ;;  %588 = vmatpush.bf16.msrb.mxu1 %v1019_v47 }
  0xc2   :  { %v271_v9 = vadd.f32 %v270_v63, %v269_v51  ;;  %v1473_v10 = vmul.f32 %v1470_v58, %v257_v62  ;;  %v943_v51 = vor.u32 %v1155_v45, %v942_v44  ;;  %v1169_v62 = vld [vmem:[#allocation9 + $0x84] sm:$0xf0]  ;;  %v1011_v63 = vor.u32 %v1170_v55, %v1008_v56  ;;  %v1199_v55 = vld [vmem:[#allocation12 + $0x78] sm:$0xff] }
  0xc3   :  { %v277_v16 = vadd.f32 %v276_v4, %v275_v57  ;;  %v1476_v17 = vmul.f32 %v1470_v58, %v263_v3  ;;  %562 = vmatpush.bf16.msra.mxu3 %v1015_v37  ;;  %v934_v57 = vld [vmem:[#allocation9] sm:$0xf]  ;;  %575 = vmatpush.bf16.msrb.mxu0 %v955_v42  ;;  %v1168_v3 = vld [vmem:[#allocation9 + $0x84] sm:$0xf]  ;;  %v1000_v4 = vld [vmem:[#allocation9 + $0x88] sm:$0xf0]  ;;  %v999_v5 = vor.u32 %v1169_v62, %v998_v61 }
  0xc4   :  { %v281_v22 = vmul.f32 %v1470_v58, %v271_v9  ;;  %v283_v23 = vmul.f32 %v1473_v10, %v1473_v10  ;;  %550 = vmatpush.bf16.msra.mxu2 %v943_v51  ;;  %v935_v2 = vor.u32 %v1153_v60, %v934_v57  ;;  %v1003_v9 = vor.u32 %v1168_v3, %v1000_v4 }
  0xc5   :  { %v282_v29 = vmul.f32 %v1470_v58, %v277_v16  ;;  %v284_v30 = vmul.f32 %v1476_v17, %v1476_v17  ;;  %589 = vmatpush.bf16.msrb.mxu1 %v1011_v63  ;;  %v345_v39 = vshrl.u32 %v344_v36, 7 }
  0xc6   :  { %v285_v35 = vsub.f32 %v281_v22, %v283_v23 }
  0xc7   :  { %v286_v41 = vsub.f32 %v282_v29, %v284_v30  ;;  %563 = vmatpush.bf16.msra.mxu3 %v1007_v54  ;;  %576 = vmatpush.bf16.msrb.mxu0 %v947_v59  ;;  %vm347_vm11 = vcmp.lt.s32.totalorder %v345_v39, %v346_v40  ;;  %v1191_v54 = vld [vmem:[#allocation12 + $0x38] sm:$0xff] }
  0xc8   :  { %v287_v46 = vadd.f32 1e-05, %v285_v35  ;;  %551 = vmatpush.bf16.msra.mxu2 %v935_v2  ;;  %vm1060_vm14 = vmpackc.low %vm347_vm11, %vm347_vm11 }
  0xc9   :  { %v288_v50 = vadd.f32 1e-05, %v286_v41  ;;  %590 = vmatpush.bf16.msrb.mxu1 %v1003_v9 }
  0xca   :  { %1215 = vrsqrt.f32 %v287_v46  ;;  %vm295_vm8 = vweird.f32 %v287_v46 }
  0xcb   :  { %1217 = vrsqrt.f32 %v288_v50  ;;  %564 = vmatpush.bf16.msra.mxu3 %v999_v5  ;;  %577 = vmatpush.bf16.msrb.mxu0 %v939_v6  ;;  %vm305_vm5 = vweird.f32 %v288_v50 }
  0xcc   :  { %822 = vmatpush.bf16.msrb.mxu2 %v1191_v54 }
  0xcf   :  { %835 = vmatpush.bf16.msrb.mxu3 %v1199_v55 }
  0xd0   :  { %v1216_v8 = vpop.eup %1215  ;;  %823 = vmatpush.bf16.msrb.mxu2 %v1190_v0 }
  0xd1   :  { %v1218_v12 = vpop.eup %1217  ;;  %v290_v13 = vmul.f32 %v1216_v8, %v287_v46  ;;  %vm296_vm6 = vweird.f32 %v1216_v8 }
  0xd2   :  { %v300_v14 = vmul.f32 %v1218_v12, %v288_v50  ;;  %vm306_vm4 = vweird.f32 %v1218_v12  ;;  %vm297_vm10 = vmor %vm295_vm8, %vm296_vm6 }
  0xd3   :  { %v291_v15 = vmul.f32 %v1216_v8, %v290_v13  ;;  %vm307_vm7 = vmor %vm305_vm5, %vm306_vm4  ;;  %836 = vmatpush.bf16.msrb.mxu3 %v1198_v1 }
  0xd4   :  { %v301_v16 = vmul.f32 %v1218_v12, %v300_v14 }
  0xd5   :  { %v292_v18 = vmul.f32 0.5, %v291_v15  ;;  %v1189_v15 = vld [vmem:[#allocation12 + $0x28] sm:$0xff] }
  0xd6   :  { %v302_v19 = vmul.f32 0.5, %v301_v16  ;;  %v1197_v16 = vld [vmem:[#allocation12 + $0x68] sm:$0xff]  ;;  %824 = vmatpush.bf16.msrb.mxu2 %v1189_v15 }
  0xd7   :  { %v293_v20 = vsub.f32 1.5, %v292_v18  ;;  %837 = vmatpush.bf16.msrb.mxu3 %v1197_v16 }
  0xd8   :  { %v303_v21 = vsub.f32 1.5, %v302_v19 }
  0xd9   :  { %v294_v22 = vmul.f32 %v1216_v8, %v293_v20 }
  0xda   :  { %v304_v23 = vmul.f32 %v1218_v12, %v303_v21 }
  0xdb   :  { %v298_v27 = vsel %vm297_vm10, %v1216_v8, %v294_v22 }
  0xdc   :  { %v308_v24 = vsel %vm307_vm7, %v1218_v12, %v304_v23 }
  0xdd   :  { %v311_v26 = vrot.slane %v308_v24, 7 }
  0xdf   :  { %v313_v28 = vsel %vm312_vm9, %v298_v27, %v311_v26 }
  0xe0   :  { %v315_v29 = vmul.f32 %v313_v28, %v250_v25  ;;  %v1188_v28 = vld [vmem:[#allocation12 + $0x20] sm:$0xff] }
  0xe1   :  { %825 = vmatpush.bf16.msrb.mxu2 %v1188_v28 }
  0xe2   :  { %v317_v30 = vperm.slane %v315_v29, 0  ;;  %v318_v31 = vperm.slane %v315_v29, 1  ;;  %v1196_v29 = vld [vmem:[#allocation12 + $0x60] sm:$0xff] }
  0xe3   :  { %838 = vmatpush.bf16.msrb.mxu3 %v1196_v29 }
  0xe4   :  { %v322_v32 = vmul.f32 %v318_v31, %v1476_v17  ;;  %v321_v34 = vmul.f32 %v317_v30, %v1473_v10  ;;  %v329_v41 = vmul.f32 %v317_v30, %v1458_v7  ;;  %v330_v17 = vmul.f32 %v318_v31, %v1463_v11 }
  0xe6   :  { %v325_v35 = vrot.slane %v322_v32, 7 }
  0xe8   :  { %v326_v37 = vsel %vm312_vm9, %v321_v34, %v325_v35 }
  0xe9   :  { %v328_v38 = vsub.f32 %v251_v33, %v326_v37  ;;  %v1187_v37 = vld [vmem:[#allocation12 + $0x18] sm:$0xff] }
  0xea   :  { %826 = vmatpush.bf16.msrb.mxu2 %v1187_v37 }
  0xeb   :  { %v332_v42 = vperm.slane %v328_v38, 0  ;;  %v333_v43 = vperm.slane %v328_v38, 1  ;;  %v1195_v38 = vld [vmem:[#allocation12 + $0x58] sm:$0xff] }
  0xec   :  { %839 = vmatpush.bf16.msrb.mxu3 %v1195_v38 }
  0xed   :  { %v336_v44 = vadd.f32 %v332_v42, %v329_v41  ;;  %v337_v45 = vadd.f32 %v333_v43, %v330_v17  ;;  %v1186_v42 = vld [vmem:[#allocation12 + $0x10] sm:$0xff] }
  0xee   :  { %v1194_v17 = vld [vmem:[#allocation12 + $0x50] sm:$0xff]  ;;  %827 = vmatpush.bf16.msrb.mxu2 %v1186_v42 }
  0xef   :  { %vm338_vm12 = vcmp.ge.f32.partialorder %v336_v44, 0.0  ;;  %v340_v10 = vmul.f32 0.01, %v336_v44  ;;  %vm339_vm13 = vcmp.ge.f32.partialorder %v337_v45, 0.0  ;;  %v341_v46 = vmul.f32 0.01, %v337_v45 }
  0xf0   :  { %840 = vmatpush.bf16.msrb.mxu3 %v1194_v17 }
  0xf1   :  { %v342_v47 = vsel %vm338_vm12, %v336_v44, %v340_v10  ;;  %v343_v48 = vsel %vm339_vm13, %v337_v45, %v341_v46  ;;  %v1185_v10 = vld [vmem:[#allocation12 + $0x8] sm:$0xff] }
  0xf2   :  { %v1061_v49 = vpack.c.bf16 %v342_v47, %v342_v47  ;;  %v1064_v50 = vpack.c.bf16 %v343_v48, %v343_v48  ;;  %v1193_v46 = vld [vmem:[#allocation12 + $0x48] sm:$0xff]  ;;  %828 = vmatpush.bf16.msrb.mxu2 %v1185_v10 }
  0xf4   :  { %1062 = vmatmul.msk.bf16.vlgmr.msra.gmra.mxu2 %vm1060_vm14, %v1061_v49  ;;  %1065 = vmatmul.msk.bf16.vlgmr.msra.gmra.mxu3 %vm1060_vm14, %v1064_v50 }
  0xf5   :  { %1068 = vmatmul.msk.bf16.vlgmr.msrb.gmra.mxu0 %vm1060_vm14, %v1061_v49  ;;  %1071 = vmatmul.msk.bf16.vlgmr.msrb.gmra.mxu1 %vm1060_vm14, %v1064_v50  ;;  %v1184_v49 = vld [vmem:[#allocation12] sm:$0xff] }
  0xf6   :  { %841 = vmatpush.bf16.msrb.mxu3 %v1193_v46  ;;  %v1192_v50 = vld [vmem:[#allocation12 + $0x40] sm:$0xff]  ;;  %829 = vmatpush.bf16.msrb.mxu2 %v1184_v49 }
  0xfa   :  { %842 = vmatpush.bf16.msrb.mxu3 %v1192_v50 }
 0x172   :  { %v579_v7 = vpop.f32.mrf.mxu0  ;;  %v592_v51 = vpop.f32.mrf.mxu1 }
 0x173   :  { %v1499_v11 = vadd.f32 %v592_v51, %v579_v7 }
 0x175   :  { %v604_v52 = vrot.slane %v1499_v11, 4  ;;  %v611_v53 = vmul.f32 %v1499_v11, %v1499_v11 }
 0x177   :  { %v605_v56 = vadd.f32 %v604_v52, %v1499_v11  ;;  %v618_v57 = vrot.slane %v611_v53, 4  ;;  %v553_v59 = vpop.f32.mrf.mxu2  ;;  %v566_v60 = vpop.f32.mrf.mxu3 }
 0x178   :  { %v1505_v61 = vadd.f32 %v566_v60, %v553_v59 }
 0x179   :  { %v606_v62 = vrot.slane %v605_v56, 2  ;;  %v619_v63 = vadd.f32 %v618_v57, %v611_v53 }
 0x17a   :  { %v598_v2 = vrot.slane %v1505_v61, 4  ;;  %v610_v3 = vmul.f32 %v1505_v61, %v1505_v61  ;;  %v581_v4 = vpop.f32.mrf.mxu0  ;;  %v594_v5 = vpop.f32.mrf.mxu1 }
 0x17b   :  { %v607_v6 = vadd.f32 %v606_v62, %v605_v56  ;;  %v620_v8 = vrot.slane %v619_v63, 2 }
 0x17c   :  { %v599_v9 = vadd.f32 %v598_v2, %v1505_v61  ;;  %v612_v12 = vrot.slane %v610_v3, 4 }
 0x17d   :  { %v608_v13 = vrot.slane %v607_v6, 1  ;;  %v621_v14 = vadd.f32 %v620_v8, %v619_v63  ;;  %v596_v63 = vld [vmem:[%s1539_s6] sm:$0x3] }
 0x17e   :  { %v600_v18 = vrot.slane %v599_v9, 2  ;;  %v613_v19 = vadd.f32 %v612_v12, %v610_v3  ;;  %v597_v12 = vld [vmem:[#allocation10] sm:$0x3] }
 0x17f   :  { %v609_v20 = vadd.f32 %v608_v13, %v607_v6  ;;  %v622_v21 = vrot.slane %v621_v14, 1  ;;  %v555_v22 = vpop.f32.mrf.mxu2  ;;  %v568_v23 = vpop.f32.mrf.mxu3 }
 0x180   :  { %v601_v24 = vadd.f32 %v600_v18, %v599_v9  ;;  %v614_v25 = vrot.slane %v613_v19, 2 }
 0x181   :  { %v623_v26 = vadd.f32 %v622_v21, %v621_v14  ;;  %v1512_v27 = vmul.f32 %v609_v20, %v1470_v58 }
 0x182   :  { %v602_v30 = vrot.slane %v601_v24, 1  ;;  %v615_v31 = vadd.f32 %v614_v25, %v613_v19 }
 0x183   :  { %v627_v32 = vmul.f32 %v623_v26, %v1470_v58  ;;  %v629_v33 = vmul.f32 %v1512_v27, %v1512_v27 }
 0x184   :  { %v603_v34 = vadd.f32 %v602_v30, %v601_v24  ;;  %v616_v35 = vrot.slane %v615_v31, 1 }
 0x185   :  { %v631_v36 = vsub.f32 %v627_v32, %v629_v33 }
 0x186   :  { %v617_v39 = vadd.f32 %v616_v35, %v615_v31  ;;  %v624_v40 = vmul.f32 %v603_v34, %v1470_v58 }
 0x187   :  { %v633_v41 = vadd.f32 1e-05, %v631_v36 }
 0x188   :  { %v626_v43 = vmul.f32 %v617_v39, %v1470_v58  ;;  %v628_v44 = vmul.f32 %v624_v40, %v624_v40 }
 0x189   :  { %1219 = vrsqrt.f32 %v633_v41  ;;  %vm650_vm0 = vweird.f32 %v633_v41 }
 0x18a   :  { %v630_v45 = vsub.f32 %v626_v43, %v628_v44 }
 0x18c   :  { %v632_v47 = vadd.f32 1e-05, %v630_v45 }
 0x18e   :  { %1221 = vrsqrt.f32 %v632_v47  ;;  %vm640_vm3 = vweird.f32 %v632_v47 }
 0x18f   :  { %v1220_v48 = vpop.eup %1219 }
 0x190   :  { %v645_v7 = vmul.f32 %v1220_v48, %v633_v41  ;;  %vm651_vm15 = vweird.f32 %v1220_v48 }
 0x191   :  { %vm652_vm1 = vmor %vm650_vm0, %vm651_vm15 }
 0x192   :  { %v646_v51 = vmul.f32 %v1220_v48, %v645_v7 }
 0x194   :  { %v1222_v52 = vpop.eup %1221  ;;  %v647_v58 = vmul.f32 0.5, %v646_v51 }
 0x195   :  { %v635_v53 = vmul.f32 %v1222_v52, %v632_v47  ;;  %vm641_vm2 = vweird.f32 %v1222_v52 }
 0x196   :  { %v648_v54 = vsub.f32 1.5, %v647_v58  ;;  %vm642_vm4 = vmor %vm640_vm3, %vm641_vm2 }
 0x197   :  { %v636_v55 = vmul.f32 %v1222_v52, %v635_v53 }
 0x198   :  { %v649_v56 = vmul.f32 %v1220_v48, %v648_v54 }
 0x199   :  { %v637_v57 = vmul.f32 0.5, %v636_v55 }
 0x19a   :  { %v653_v60 = vsel %vm652_vm1, %v1220_v48, %v649_v56 }
 0x19b   :  { %v638_v59 = vsub.f32 1.5, %v637_v57  ;;  %v656_v0 = vrot.slane %v653_v60, 7 }
 0x19d   :  { %v639_v62 = vmul.f32 %v1222_v52, %v638_v59 }
 0x19f   :  { %v643_v1 = vsel %vm642_vm4, %v1222_v52, %v639_v62 }
 0x1a0   :  { %v657_v2 = vsel %vm312_vm9, %v643_v1, %v656_v0 }
 0x1a1   :  { %v659_v3 = vmul.f32 %v657_v2, %v596_v63 }
 0x1a3   :  { %v661_v4 = vperm.slane %v659_v3, 0  ;;  %v662_v5 = vperm.slane %v659_v3, 1 }
 0x1a5   :  { %v666_v6 = vmul.f32 %v662_v5, %v1512_v27  ;;  %v665_v8 = vmul.f32 %v661_v4, %v624_v40  ;;  %v673_v15 = vmul.f32 %v661_v4, %v1505_v61  ;;  %v674_v18 = vmul.f32 %v662_v5, %v1499_v11  ;;  %v1212_v61 = vld [vmem:[%s1542_s9] ss:$0 sm:$0xff] }
 0x1a7   :  { %v669_v9 = vrot.slane %v666_v6, 7 }
 0x1a9   :  { %v670_v13 = vsel %vm312_vm9, %v665_v8, %v669_v9 }
 0x1aa   :  { %v672_v14 = vsub.f32 %v597_v12, %v670_v13 }
 0x1ac   :  { %v676_v16 = vperm.slane %v672_v14, 0  ;;  %v677_v19 = vperm.slane %v672_v14, 1 }
 0x1ae   :  { %v680_v20 = vadd.f32 %v676_v16, %v673_v15  ;;  %v681_v21 = vadd.f32 %v677_v19, %v674_v18 }
 0x1b0   :  { %vm682_vm5 = vcmp.ge.f32.partialorder %v680_v20, 0.0  ;;  %v684_v22 = vmul.f32 0.01, %v680_v20  ;;  %vm683_vm6 = vcmp.ge.f32.partialorder %v681_v21, 0.0  ;;  %v685_v23 = vmul.f32 0.01, %v681_v21 }
 0x1b2   :  { %v686_v24 = vsel %vm682_vm5, %v680_v20, %v684_v22  ;;  %v687_v25 = vsel %vm683_vm6, %v681_v21, %v685_v23 }
 0x1b3   :  { %v688_v26 = vpack.c.bf16 %v686_v24, %v686_v24  ;;  %v689_v27 = vpack.c.bf16 %v687_v25, %v687_v25 }
 0x1b5   :  { %830 = vmatmul.bf16.vlgmr.msrb.gmra.mxu2 %v688_v26  ;;  %843 = vmatmul.bf16.vlgmr.msrb.gmra.mxu3 %v689_v27 }
 0x238   :  { %v831_v28 = vpop.f32.mrf.mxu2  ;;  %v844_v29 = vpop.f32.mrf.mxu3 }
 0x239   :  { %v832_v11 = vadd.f32 %v1212_v61, %v831_v28 }
 0x23b   :  { %v845_v30 = vadd.f32 %v844_v29, %v832_v11 }
 0x23d   :  { %848 = vst [vmem:[#allocation13] sm:$0xff] %v845_v30 }
 0x23e   :  { %859 = dma.vmem_to_hbm [thread:$0]  %s855_s2, 128, %s857_s30, [#allocation6]  }
 0x240   :  { %v833_v31 = vpop.f32.mrf.mxu2  ;;  %v846_v32 = vpop.f32.mrf.mxu3 }
 0x241   :  { %1373 = dma.done.wait [#allocation6], 128  }
 0x242   :  { %1374 = vsyncadd [#allocation6], 4294967168 }
 0x243   :  { %864 = vsyncpa [#allocation5], 1 }
 0x244   :  { %865 = vsyncpa [#allocation8], 1 }
 0x245   :  { %866 = vsyncpa [#allocation11], 1 }
 0x246   :  { %867 = vsyncpa [#allocation6], 1 }

</bundles_post_ra>
